<compile_context>
chip_gen: v6e
topology: v6e:2x2x1
jax: 0.10.0
libtpu: 0.0.40
codegen_flags: <defaults>
</compile_context>

<pallas_src>
import jax
import jax.numpy as jnp
from jax.experimental import pallas as pl
from jax.experimental.pallas import tpu as pltpu


def lstm_recurrence_kernel(gx_ref, len_ref, whh_ref, c_out_ref):
    # gx_ref   : (T, B, 4H) f32  pre-computed input pre-activations, time-major:
    #            tanh(embed) @ W_ih^T + (b_ih + b_hh), gate order [i, f, o, g].
    # len_ref  : (B, H) int32    valid length per sequence (pre-broadcast).
    # whh_ref  : (H, 4H) f32     recurrent weight, transposed, columns [i, f, o, g].
    # c_out_ref: (B, H) f32      final cell state per sequence (== c.squeeze(0)).
    T, B, H4 = gx_ref.shape
    H = H4 // 4

    whh = whh_ref[...]          # recurrent weight stays resident for all steps
    len_b = len_ref[...]        # (B, H) int32

    def step(t, carry):
        h, c = carry
        # (B, 4H) = input pre-activation + recurrent projection (MXU)
        g = gx_ref[t] + jnp.dot(h, whh, preferred_element_type=jnp.float32)
        sig = jax.nn.sigmoid(g[:, :3 * H])        # [i | f | o] in one EUP pass
        g_g = jnp.tanh(g[:, 3 * H:])              # cell candidate
        i_g = sig[:, 0 * H:1 * H]
        f_g = sig[:, 1 * H:2 * H]
        o_g = sig[:, 2 * H:3 * H]
        c_new = f_g * c + i_g * g_g
        h_new = o_g * jnp.tanh(c_new)
        # pack_padded_sequence semantics: freeze the state once t >= q_len[b]
        valid = t < len_b
        return jnp.where(valid, h_new, h), jnp.where(valid, c_new, c)

    h0 = jnp.zeros((B, H), jnp.float32)
    c0 = jnp.zeros((B, H), jnp.float32)
    _, c_final = jax.lax.fori_loop(0, T, step, (h0, c0), unroll=True)
    c_out_ref[...] = c_final.astype(c_out_ref.dtype)


def _reorder_gate_cols(w, H):
    # PyTorch gate order along the last axis: [i | f | g | o] -> [i | f | o | g]
    return jnp.concatenate([w[..., :2 * H], w[..., 3 * H:], w[..., 2 * H:3 * H]],
                           axis=-1)


def text_encoder_forward(q_tokens, q_len, params):
    """q_tokens: (B, T) int32, q_len: (B,) int32 -> (B, dim_q) final LSTM cell state."""
    emb_table = params["embedding"]        # (num_tokens, E)
    w_ih_t = params["w_ih_t"]              # (E, 4H)  == weight_ih_l0.T, order [i,f,g,o]
    w_hh_t = params["w_hh_t"]              # (H, 4H)  == weight_hh_l0.T, order [i,f,g,o]
    b = params["b"]                        # (1, 4H)  == bias_ih_l0 + bias_hh_l0
    B, T = q_tokens.shape
    E = emb_table.shape[1]
    H4 = w_ih_t.shape[1]
    H = H4 // 4

    # One-time layout cost: reorder gate columns to [i, f, o, g] so the kernel
    # can apply sigmoid to one contiguous 3H block per step.
    w_ih_t = _reorder_gate_cols(w_ih_t, H)
    w_hh_t = _reorder_gate_cols(w_hh_t, H)
    b = _reorder_gate_cols(b, H)

    # ---- Hoisted, time-parallel part of the forward ---------------------------
    # TODO(synk): the embedding row gather is data-dependent; it stays in the
    # wrapper (an in-kernel version would need per-token scalar-prefetch DMA).
    embedded = jnp.take(emb_table, q_tokens, axis=0)                 # (B, T, E)
    tanhed = jnp.tanh(embedded)                                      # dropout(p=0) = identity
    gates_x = jnp.dot(tanhed.reshape(B * T, E), w_ih_t,
                      precision=jax.lax.Precision.HIGHEST) + b       # one batched GEMM
    gates_x = jnp.transpose(gates_x.reshape(B, T, H4), (1, 0, 2))    # (T, B, 4H) time-major

    lens = jnp.broadcast_to(q_len.astype(jnp.int32)[:, None], (B, H))  # (B, H)

    vmem = pltpu.MemorySpace.VMEM
    c = pl.pallas_call(
        lstm_recurrence_kernel,
        out_shape=jax.ShapeDtypeStruct((B, H), emb_table.dtype),
        in_specs=[pl.BlockSpec(memory_space=vmem),    # gates_x
                  pl.BlockSpec(memory_space=vmem),    # lens
                  pl.BlockSpec(memory_space=vmem)],   # w_hh_t
        out_specs=pl.BlockSpec(memory_space=vmem),
        cost_estimate=pl.CostEstimate(
            flops=2 * T * B * H * H4 + 10 * T * B * H,
            transcendentals=5 * T * B * H,
            bytes_accessed=4 * (T * B * H4 + B * H + H * H4 + B * H)),
    )(gates_x, lens, w_hh_t)
    return c


def init_params(key, num_tokens, emb_size, dim_q, dtype=jnp.float32):
    k1, k2, k3 = jax.random.split(key, 3)
    # nn.Embedding(num_tokens, emb_size, padding_idx=0), xavier-initialized.
    emb = jax.random.normal(k1, (num_tokens, emb_size), dtype) * 0.1
    # nn.LSTM weights: weight_ih_l0 (4H, E), weight_hh_l0 (4H, H), gate order
    # [i, f, g, o]; stored transposed so matmuls are plain (M, K) @ (K, N).
    w_ih_t = jax.random.normal(k2, (emb_size, 4 * dim_q), dtype) * 0.1
    w_hh_t = jax.random.normal(k3, (dim_q, 4 * dim_q), dtype) * 0.1
    # The module zeroes bias_ih_l0 and bias_hh_l0 in __init__.
    b = jnp.zeros((1, 4 * dim_q), dtype)
    return {"embedding": emb, "w_ih_t": w_ih_t, "w_hh_t": w_hh_t, "b": b}


def text_encoder_reference(q_tokens, q_len, params):
    """Pure-JAX reference of the PyTorch TextEncoder forward (sanity check)."""
    emb = jnp.take(params["embedding"], q_tokens, axis=0)            # (B, T, E)
    x = jnp.tanh(emb)
    w_ih_t, w_hh_t, b = params["w_ih_t"], params["w_hh_t"], params["b"]
    B, T, _ = x.shape
    H4 = w_ih_t.shape[1]
    H = H4 // 4
    h = jnp.zeros((B, H), jnp.float32)
    c = jnp.zeros((B, H), jnp.float32)
    hi = jax.lax.Precision.HIGHEST
    for t in range(T):
        g = (jnp.dot(x[:, t, :], w_ih_t, precision=hi) + b
             + jnp.dot(h, w_hh_t, precision=hi))
        i_g = jax.nn.sigmoid(g[:, :H])
        f_g = jax.nn.sigmoid(g[:, H:2 * H])
        g_g = jnp.tanh(g[:, 2 * H:3 * H])
        o_g = jax.nn.sigmoid(g[:, 3 * H:])
        c_new = f_g * c + i_g * g_g
        h_new = o_g * jnp.tanh(c_new)
        valid = (t < q_len)[:, None]
        c = jnp.where(valid, c_new, c)
        h = jnp.where(valid, h_new, h)
    return c


if __name__ == "__main__":
    num_tokens, emb_size, dim_q = 32, 32, 32     # small TextEncoder dims
    B, T = 2, 8

    key = jax.random.PRNGKey(0)
    ktok, kparam = jax.random.split(key)
    params = init_params(kparam, num_tokens, emb_size, dim_q)

    # Lengths sorted descending, as required by pack_padded_sequence.
    q_len = jnp.array([T, 5], dtype=jnp.int32)
    q_tokens = jax.random.randint(ktok, (B, T), 1, num_tokens, dtype=jnp.int32)
    pos = jnp.arange(T, dtype=jnp.int32)[None, :]
    q_tokens = jnp.where(pos < q_len[:, None], q_tokens, 0)   # pad with padding_idx=0

    out = jax.jit(text_encoder_forward)(q_tokens, q_len, params)
    out = jax.block_until_ready(out)

    ref = text_encoder_reference(q_tokens, q_len, params)
    assert out.shape == (B, dim_q), out.shape
    assert jnp.allclose(out, ref, atol=1e-4, rtol=1e-4), "mismatch vs pure-JAX reference"

    print("KERNEL_OK")
</pallas_src>

<mosaic_0001>
module attributes {stable_mosaic.version = 11 : i64} {
  func.func @lstm_recurrence_kernel(%arg0: memref<8x2x128xf32, #tpu.memory_space<vmem>>, %arg1: memref<2x32xi32, #tpu.memory_space<vmem>>, %arg2: memref<32x128xf32, #tpu.memory_space<vmem>>, %arg3: memref<2x32xf32, #tpu.memory_space<vmem>>) attributes {dimension_semantics = [], scalar_prefetch = 0 : i64, scratch_operands = 0 : i64, tpu.core_type = #tpu.core_type<tc>} {
    %c0 = arith.constant 0 : index
    %c0_0 = arith.constant 0 : index
    %0 = vector.load %arg2[%c0, %c0_0] : memref<32x128xf32, #tpu.memory_space<vmem>>, vector<32x128xf32>
    %c0_1 = arith.constant 0 : index
    %c0_2 = arith.constant 0 : index
    %1 = vector.load %arg1[%c0_1, %c0_2] : memref<2x32xi32, #tpu.memory_space<vmem>>, vector<2x32xi32>
    %cst = arith.constant 0.000000e+00 : f32
    %2 = vector.broadcast %cst : f32 to vector<2x32xf32>
    %cst_3 = arith.constant 0.000000e+00 : f32
    %3 = vector.broadcast %cst_3 : f32 to vector<2x32xf32>
    %c0_i32 = arith.constant 0 : i32
    %4 = arith.index_cast %c0_i32 : i32 to index
    %c0_4 = arith.constant 0 : index
    %c0_5 = arith.constant 0 : index
    %5 = vector.load %arg0[%4, %c0_4, %c0_5] : memref<8x2x128xf32, #tpu.memory_space<vmem>>, vector<1x2x128xf32>
    %6 = vector.shape_cast %5 : vector<1x2x128xf32> to vector<2x128xf32>
    %cst_6 = arith.constant dense<0.000000e+00> : vector<2x128xf32>
    %7 = tpu.matmul %2, %0, %cst_6 {dimension_numbers = #tpu.dot_dimension_numbers<[1], [0], [0], [1], [0, 0, 1, 1], [], []>} : vector<2x32xf32>, vector<32x128xf32>, vector<2x128xf32> -> vector<2x128xf32>
    %8 = arith.addf %6, %7 : vector<2x128xf32>
    %9 = vector.extract_strided_slice %8 {offsets = [0, 0], sizes = [2, 96], strides = [1, 1]} : vector<2x128xf32> to vector<2x96xf32>
    %10 = arith.negf %9 : vector<2x96xf32>
    %11 = math.exp %10 : vector<2x96xf32>
    %cst_7 = arith.constant 1.000000e+00 : f32
    %12 = vector.broadcast %cst_7 : f32 to vector<2x96xf32>
    %13 = arith.addf %12, %11 : vector<2x96xf32>
    %14 = arith.divf %12, %13 : vector<2x96xf32>
    %15 = vector.extract_strided_slice %8 {offsets = [0, 96], sizes = [2, 32], strides = [1, 1]} : vector<2x128xf32> to vector<2x32xf32>
    %16 = math.tanh %15 : vector<2x32xf32>
    %17 = vector.extract_strided_slice %14 {offsets = [0, 0], sizes = [2, 32], strides = [1, 1]} : vector<2x96xf32> to vector<2x32xf32>
    %18 = vector.extract_strided_slice %14 {offsets = [0, 32], sizes = [2, 32], strides = [1, 1]} : vector<2x96xf32> to vector<2x32xf32>
    %19 = vector.extract_strided_slice %14 {offsets = [0, 64], sizes = [2, 32], strides = [1, 1]} : vector<2x96xf32> to vector<2x32xf32>
    %20 = arith.mulf %18, %3 : vector<2x32xf32>
    %21 = arith.mulf %17, %16 : vector<2x32xf32>
    %22 = arith.addf %20, %21 : vector<2x32xf32>
    %23 = math.tanh %22 : vector<2x32xf32>
    %24 = arith.mulf %19, %23 : vector<2x32xf32>
    %25 = vector.broadcast %c0_i32 : i32 to vector<2x32xi32>
    %26 = arith.cmpi slt, %25, %1 : vector<2x32xi32>
    %27 = arith.select %26, %24, %2 : vector<2x32xi1>, vector<2x32xf32>
    %28 = arith.select %26, %22, %3 : vector<2x32xi1>, vector<2x32xf32>
    %c1_i32 = arith.constant 1 : i32
    %29 = arith.index_cast %c1_i32 : i32 to index
    %c0_8 = arith.constant 0 : index
    %c0_9 = arith.constant 0 : index
    %30 = vector.load %arg0[%29, %c0_8, %c0_9] : memref<8x2x128xf32, #tpu.memory_space<vmem>>, vector<1x2x128xf32>
    %31 = vector.shape_cast %30 : vector<1x2x128xf32> to vector<2x128xf32>
    %cst_10 = arith.constant dense<0.000000e+00> : vector<2x128xf32>
    %32 = tpu.matmul %27, %0, %cst_10 {dimension_numbers = #tpu.dot_dimension_numbers<[1], [0], [0], [1], [0, 0, 1, 1], [], []>} : vector<2x32xf32>, vector<32x128xf32>, vector<2x128xf32> -> vector<2x128xf32>
    %33 = arith.addf %31, %32 : vector<2x128xf32>
    %34 = vector.extract_strided_slice %33 {offsets = [0, 0], sizes = [2, 96], strides = [1, 1]} : vector<2x128xf32> to vector<2x96xf32>
    %35 = arith.negf %34 : vector<2x96xf32>
    %36 = math.exp %35 : vector<2x96xf32>
    %cst_11 = arith.constant 1.000000e+00 : f32
    %37 = vector.broadcast %cst_11 : f32 to vector<2x96xf32>
    %38 = arith.addf %37, %36 : vector<2x96xf32>
    %39 = arith.divf %37, %38 : vector<2x96xf32>
    %40 = vector.extract_strided_slice %33 {offsets = [0, 96], sizes = [2, 32], strides = [1, 1]} : vector<2x128xf32> to vector<2x32xf32>
    %41 = math.tanh %40 : vector<2x32xf32>
    %42 = vector.extract_strided_slice %39 {offsets = [0, 0], sizes = [2, 32], strides = [1, 1]} : vector<2x96xf32> to vector<2x32xf32>
    %43 = vector.extract_strided_slice %39 {offsets = [0, 32], sizes = [2, 32], strides = [1, 1]} : vector<2x96xf32> to vector<2x32xf32>
    %44 = vector.extract_strided_slice %39 {offsets = [0, 64], sizes = [2, 32], strides = [1, 1]} : vector<2x96xf32> to vector<2x32xf32>
    %45 = arith.mulf %43, %28 : vector<2x32xf32>
    %46 = arith.mulf %42, %41 : vector<2x32xf32>
    %47 = arith.addf %45, %46 : vector<2x32xf32>
    %48 = math.tanh %47 : vector<2x32xf32>
    %49 = arith.mulf %44, %48 : vector<2x32xf32>
    %50 = vector.broadcast %c1_i32 : i32 to vector<2x32xi32>
    %51 = arith.cmpi slt, %50, %1 : vector<2x32xi32>
    %52 = arith.select %51, %49, %27 : vector<2x32xi1>, vector<2x32xf32>
    %53 = arith.select %51, %47, %28 : vector<2x32xi1>, vector<2x32xf32>
    %c2_i32 = arith.constant 2 : i32
    %54 = arith.index_cast %c2_i32 : i32 to index
    %c0_12 = arith.constant 0 : index
    %c0_13 = arith.constant 0 : index
    %55 = vector.load %arg0[%54, %c0_12, %c0_13] : memref<8x2x128xf32, #tpu.memory_space<vmem>>, vector<1x2x128xf32>
    %56 = vector.shape_cast %55 : vector<1x2x128xf32> to vector<2x128xf32>
    %cst_14 = arith.constant dense<0.000000e+00> : vector<2x128xf32>
    %57 = tpu.matmul %52, %0, %cst_14 {dimension_numbers = #tpu.dot_dimension_numbers<[1], [0], [0], [1], [0, 0, 1, 1], [], []>} : vector<2x32xf32>, vector<32x128xf32>, vector<2x128xf32> -> vector<2x128xf32>
    %58 = arith.addf %56, %57 : vector<2x128xf32>
    %59 = vector.extract_strided_slice %58 {offsets = [0, 0], sizes = [2, 96], strides = [1, 1]} : vector<2x128xf32> to vector<2x96xf32>
    %60 = arith.negf %59 : vector<2x96xf32>
    %61 = math.exp %60 : vector<2x96xf32>
    %cst_15 = arith.constant 1.000000e+00 : f32
    %62 = vector.broadcast %cst_15 : f32 to vector<2x96xf32>
    %63 = arith.addf %62, %61 : vector<2x96xf32>
    %64 = arith.divf %62, %63 : vector<2x96xf32>
    %65 = vector.extract_strided_slice %58 {offsets = [0, 96], sizes = [2, 32], strides = [1, 1]} : vector<2x128xf32> to vector<2x32xf32>
    %66 = math.tanh %65 : vector<2x32xf32>
    %67 = vector.extract_strided_slice %64 {offsets = [0, 0], sizes = [2, 32], strides = [1, 1]} : vector<2x96xf32> to vector<2x32xf32>
    %68 = vector.extract_strided_slice %64 {offsets = [0, 32], sizes = [2, 32], strides = [1, 1]} : vector<2x96xf32> to vector<2x32xf32>
    %69 = vector.extract_strided_slice %64 {offsets = [0, 64], sizes = [2, 32], strides = [1, 1]} : vector<2x96xf32> to vector<2x32xf32>
    %70 = arith.mulf %68, %53 : vector<2x32xf32>
    %71 = arith.mulf %67, %66 : vector<2x32xf32>
    %72 = arith.addf %70, %71 : vector<2x32xf32>
    %73 = math.tanh %72 : vector<2x32xf32>
    %74 = arith.mulf %69, %73 : vector<2x32xf32>
    %75 = vector.broadcast %c2_i32 : i32 to vector<2x32xi32>
    %76 = arith.cmpi slt, %75, %1 : vector<2x32xi32>
    %77 = arith.select %76, %74, %52 : vector<2x32xi1>, vector<2x32xf32>
    %78 = arith.select %76, %72, %53 : vector<2x32xi1>, vector<2x32xf32>
    %c3_i32 = arith.constant 3 : i32
    %79 = arith.index_cast %c3_i32 : i32 to index
    %c0_16 = arith.constant 0 : index
    %c0_17 = arith.constant 0 : index
    %80 = vector.load %arg0[%79, %c0_16, %c0_17] : memref<8x2x128xf32, #tpu.memory_space<vmem>>, vector<1x2x128xf32>
    %81 = vector.shape_cast %80 : vector<1x2x128xf32> to vector<2x128xf32>
    %cst_18 = arith.constant dense<0.000000e+00> : vector<2x128xf32>
    %82 = tpu.matmul %77, %0, %cst_18 {dimension_numbers = #tpu.dot_dimension_numbers<[1], [0], [0], [1], [0, 0, 1, 1], [], []>} : vector<2x32xf32>, vector<32x128xf32>, vector<2x128xf32> -> vector<2x128xf32>
    %83 = arith.addf %81, %82 : vector<2x128xf32>
    %84 = vector.extract_strided_slice %83 {offsets = [0, 0], sizes = [2, 96], strides = [1, 1]} : vector<2x128xf32> to vector<2x96xf32>
    %85 = arith.negf %84 : vector<2x96xf32>
    %86 = math.exp %85 : vector<2x96xf32>
    %cst_19 = arith.constant 1.000000e+00 : f32
    %87 = vector.broadcast %cst_19 : f32 to vector<2x96xf32>
    %88 = arith.addf %87, %86 : vector<2x96xf32>
    %89 = arith.divf %87, %88 : vector<2x96xf32>
    %90 = vector.extract_strided_slice %83 {offsets = [0, 96], sizes = [2, 32], strides = [1, 1]} : vector<2x128xf32> to vector<2x32xf32>
    %91 = math.tanh %90 : vector<2x32xf32>
    %92 = vector.extract_strided_slice %89 {offsets = [0, 0], sizes = [2, 32], strides = [1, 1]} : vector<2x96xf32> to vector<2x32xf32>
    %93 = vector.extract_strided_slice %89 {offsets = [0, 32], sizes = [2, 32], strides = [1, 1]} : vector<2x96xf32> to vector<2x32xf32>
    %94 = vector.extract_strided_slice %89 {offsets = [0, 64], sizes = [2, 32], strides = [1, 1]} : vector<2x96xf32> to vector<2x32xf32>
    %95 = arith.mulf %93, %78 : vector<2x32xf32>
    %96 = arith.mulf %92, %91 : vector<2x32xf32>
    %97 = arith.addf %95, %96 : vector<2x32xf32>
    %98 = math.tanh %97 : vector<2x32xf32>
    %99 = arith.mulf %94, %98 : vector<2x32xf32>
    %100 = vector.broadcast %c3_i32 : i32 to vector<2x32xi32>
    %101 = arith.cmpi slt, %100, %1 : vector<2x32xi32>
    %102 = arith.select %101, %99, %77 : vector<2x32xi1>, vector<2x32xf32>
    %103 = arith.select %101, %97, %78 : vector<2x32xi1>, vector<2x32xf32>
    %c4_i32 = arith.constant 4 : i32
    %104 = arith.index_cast %c4_i32 : i32 to index
    %c0_20 = arith.constant 0 : index
    %c0_21 = arith.constant 0 : index
    %105 = vector.load %arg0[%104, %c0_20, %c0_21] : memref<8x2x128xf32, #tpu.memory_space<vmem>>, vector<1x2x128xf32>
    %106 = vector.shape_cast %105 : vector<1x2x128xf32> to vector<2x128xf32>
    %cst_22 = arith.constant dense<0.000000e+00> : vector<2x128xf32>
    %107 = tpu.matmul %102, %0, %cst_22 {dimension_numbers = #tpu.dot_dimension_numbers<[1], [0], [0], [1], [0, 0, 1, 1], [], []>} : vector<2x32xf32>, vector<32x128xf32>, vector<2x128xf32> -> vector<2x128xf32>
    %108 = arith.addf %106, %107 : vector<2x128xf32>
    %109 = vector.extract_strided_slice %108 {offsets = [0, 0], sizes = [2, 96], strides = [1, 1]} : vector<2x128xf32> to vector<2x96xf32>
    %110 = arith.negf %109 : vector<2x96xf32>
    %111 = math.exp %110 : vector<2x96xf32>
    %cst_23 = arith.constant 1.000000e+00 : f32
    %112 = vector.broadcast %cst_23 : f32 to vector<2x96xf32>
    %113 = arith.addf %112, %111 : vector<2x96xf32>
    %114 = arith.divf %112, %113 : vector<2x96xf32>
    %115 = vector.extract_strided_slice %108 {offsets = [0, 96], sizes = [2, 32], strides = [1, 1]} : vector<2x128xf32> to vector<2x32xf32>
    %116 = math.tanh %115 : vector<2x32xf32>
    %117 = vector.extract_strided_slice %114 {offsets = [0, 0], sizes = [2, 32], strides = [1, 1]} : vector<2x96xf32> to vector<2x32xf32>
    %118 = vector.extract_strided_slice %114 {offsets = [0, 32], sizes = [2, 32], strides = [1, 1]} : vector<2x96xf32> to vector<2x32xf32>
    %119 = vector.extract_strided_slice %114 {offsets = [0, 64], sizes = [2, 32], strides = [1, 1]} : vector<2x96xf32> to vector<2x32xf32>
    %120 = arith.mulf %118, %103 : vector<2x32xf32>
    %121 = arith.mulf %117, %116 : vector<2x32xf32>
    %122 = arith.addf %120, %121 : vector<2x32xf32>
    %123 = math.tanh %122 : vector<2x32xf32>
    %124 = arith.mulf %119, %123 : vector<2x32xf32>
    %125 = vector.broadcast %c4_i32 : i32 to vector<2x32xi32>
    %126 = arith.cmpi slt, %125, %1 : vector<2x32xi32>
    %127 = arith.select %126, %124, %102 : vector<2x32xi1>, vector<2x32xf32>
    %128 = arith.select %126, %122, %103 : vector<2x32xi1>, vector<2x32xf32>
    %c5_i32 = arith.constant 5 : i32
    %129 = arith.index_cast %c5_i32 : i32 to index
    %c0_24 = arith.constant 0 : index
    %c0_25 = arith.constant 0 : index
    %130 = vector.load %arg0[%129, %c0_24, %c0_25] : memref<8x2x128xf32, #tpu.memory_space<vmem>>, vector<1x2x128xf32>
    %131 = vector.shape_cast %130 : vector<1x2x128xf32> to vector<2x128xf32>
    %cst_26 = arith.constant dense<0.000000e+00> : vector<2x128xf32>
    %132 = tpu.matmul %127, %0, %cst_26 {dimension_numbers = #tpu.dot_dimension_numbers<[1], [0], [0], [1], [0, 0, 1, 1], [], []>} : vector<2x32xf32>, vector<32x128xf32>, vector<2x128xf32> -> vector<2x128xf32>
    %133 = arith.addf %131, %132 : vector<2x128xf32>
    %134 = vector.extract_strided_slice %133 {offsets = [0, 0], sizes = [2, 96], strides = [1, 1]} : vector<2x128xf32> to vector<2x96xf32>
    %135 = arith.negf %134 : vector<2x96xf32>
    %136 = math.exp %135 : vector<2x96xf32>
    %cst_27 = arith.constant 1.000000e+00 : f32
    %137 = vector.broadcast %cst_27 : f32 to vector<2x96xf32>
    %138 = arith.addf %137, %136 : vector<2x96xf32>
    %139 = arith.divf %137, %138 : vector<2x96xf32>
    %140 = vector.extract_strided_slice %133 {offsets = [0, 96], sizes = [2, 32], strides = [1, 1]} : vector<2x128xf32> to vector<2x32xf32>
    %141 = math.tanh %140 : vector<2x32xf32>
    %142 = vector.extract_strided_slice %139 {offsets = [0, 0], sizes = [2, 32], strides = [1, 1]} : vector<2x96xf32> to vector<2x32xf32>
    %143 = vector.extract_strided_slice %139 {offsets = [0, 32], sizes = [2, 32], strides = [1, 1]} : vector<2x96xf32> to vector<2x32xf32>
    %144 = vector.extract_strided_slice %139 {offsets = [0, 64], sizes = [2, 32], strides = [1, 1]} : vector<2x96xf32> to vector<2x32xf32>
    %145 = arith.mulf %143, %128 : vector<2x32xf32>
    %146 = arith.mulf %142, %141 : vector<2x32xf32>
    %147 = arith.addf %145, %146 : vector<2x32xf32>
    %148 = math.tanh %147 : vector<2x32xf32>
    %149 = arith.mulf %144, %148 : vector<2x32xf32>
    %150 = vector.broadcast %c5_i32 : i32 to vector<2x32xi32>
    %151 = arith.cmpi slt, %150, %1 : vector<2x32xi32>
    %152 = arith.select %151, %149, %127 : vector<2x32xi1>, vector<2x32xf32>
    %153 = arith.select %151, %147, %128 : vector<2x32xi1>, vector<2x32xf32>
    %c6_i32 = arith.constant 6 : i32
    %154 = arith.index_cast %c6_i32 : i32 to index
    %c0_28 = arith.constant 0 : index
    %c0_29 = arith.constant 0 : index
    %155 = vector.load %arg0[%154, %c0_28, %c0_29] : memref<8x2x128xf32, #tpu.memory_space<vmem>>, vector<1x2x128xf32>
    %156 = vector.shape_cast %155 : vector<1x2x128xf32> to vector<2x128xf32>
    %cst_30 = arith.constant dense<0.000000e+00> : vector<2x128xf32>
    %157 = tpu.matmul %152, %0, %cst_30 {dimension_numbers = #tpu.dot_dimension_numbers<[1], [0], [0], [1], [0, 0, 1, 1], [], []>} : vector<2x32xf32>, vector<32x128xf32>, vector<2x128xf32> -> vector<2x128xf32>
    %158 = arith.addf %156, %157 : vector<2x128xf32>
    %159 = vector.extract_strided_slice %158 {offsets = [0, 0], sizes = [2, 96], strides = [1, 1]} : vector<2x128xf32> to vector<2x96xf32>
    %160 = arith.negf %159 : vector<2x96xf32>
    %161 = math.exp %160 : vector<2x96xf32>
    %cst_31 = arith.constant 1.000000e+00 : f32
    %162 = vector.broadcast %cst_31 : f32 to vector<2x96xf32>
    %163 = arith.addf %162, %161 : vector<2x96xf32>
    %164 = arith.divf %162, %163 : vector<2x96xf32>
    %165 = vector.extract_strided_slice %158 {offsets = [0, 96], sizes = [2, 32], strides = [1, 1]} : vector<2x128xf32> to vector<2x32xf32>
    %166 = math.tanh %165 : vector<2x32xf32>
    %167 = vector.extract_strided_slice %164 {offsets = [0, 0], sizes = [2, 32], strides = [1, 1]} : vector<2x96xf32> to vector<2x32xf32>
    %168 = vector.extract_strided_slice %164 {offsets = [0, 32], sizes = [2, 32], strides = [1, 1]} : vector<2x96xf32> to vector<2x32xf32>
    %169 = vector.extract_strided_slice %164 {offsets = [0, 64], sizes = [2, 32], strides = [1, 1]} : vector<2x96xf32> to vector<2x32xf32>
    %170 = arith.mulf %168, %153 : vector<2x32xf32>
    %171 = arith.mulf %167, %166 : vector<2x32xf32>
    %172 = arith.addf %170, %171 : vector<2x32xf32>
    %173 = math.tanh %172 : vector<2x32xf32>
    %174 = arith.mulf %169, %173 : vector<2x32xf32>
    %175 = vector.broadcast %c6_i32 : i32 to vector<2x32xi32>
    %176 = arith.cmpi slt, %175, %1 : vector<2x32xi32>
    %177 = arith.select %176, %174, %152 : vector<2x32xi1>, vector<2x32xf32>
    %178 = arith.select %176, %172, %153 : vector<2x32xi1>, vector<2x32xf32>
    %c7_i32 = arith.constant 7 : i32
    %179 = arith.index_cast %c7_i32 : i32 to index
    %c0_32 = arith.constant 0 : index
    %c0_33 = arith.constant 0 : index
    %180 = vector.load %arg0[%179, %c0_32, %c0_33] : memref<8x2x128xf32, #tpu.memory_space<vmem>>, vector<1x2x128xf32>
    %181 = vector.shape_cast %180 : vector<1x2x128xf32> to vector<2x128xf32>
    %cst_34 = arith.constant dense<0.000000e+00> : vector<2x128xf32>
    %182 = tpu.matmul %177, %0, %cst_34 {dimension_numbers = #tpu.dot_dimension_numbers<[1], [0], [0], [1], [0, 0, 1, 1], [], []>} : vector<2x32xf32>, vector<32x128xf32>, vector<2x128xf32> -> vector<2x128xf32>
    %183 = arith.addf %181, %182 : vector<2x128xf32>
    %184 = vector.extract_strided_slice %183 {offsets = [0, 0], sizes = [2, 96], strides = [1, 1]} : vector<2x128xf32> to vector<2x96xf32>
    %185 = arith.negf %184 : vector<2x96xf32>
    %186 = math.exp %185 : vector<2x96xf32>
    %cst_35 = arith.constant 1.000000e+00 : f32
    %187 = vector.broadcast %cst_35 : f32 to vector<2x96xf32>
    %188 = arith.addf %187, %186 : vector<2x96xf32>
    %189 = arith.divf %187, %188 : vector<2x96xf32>
    %190 = vector.extract_strided_slice %183 {offsets = [0, 96], sizes = [2, 32], strides = [1, 1]} : vector<2x128xf32> to vector<2x32xf32>
    %191 = math.tanh %190 : vector<2x32xf32>
    %192 = vector.extract_strided_slice %189 {offsets = [0, 0], sizes = [2, 32], strides = [1, 1]} : vector<2x96xf32> to vector<2x32xf32>
    %193 = vector.extract_strided_slice %189 {offsets = [0, 32], sizes = [2, 32], strides = [1, 1]} : vector<2x96xf32> to vector<2x32xf32>
    %194 = vector.extract_strided_slice %189 {offsets = [0, 64], sizes = [2, 32], strides = [1, 1]} : vector<2x96xf32> to vector<2x32xf32>
    %195 = arith.mulf %193, %178 : vector<2x32xf32>
    %196 = arith.mulf %192, %191 : vector<2x32xf32>
    %197 = arith.addf %195, %196 : vector<2x32xf32>
    %198 = math.tanh %197 : vector<2x32xf32>
    %199 = arith.mulf %194, %198 : vector<2x32xf32>
    %200 = vector.broadcast %c7_i32 : i32 to vector<2x32xi32>
    %201 = arith.cmpi slt, %200, %1 : vector<2x32xi32>
    %202 = arith.select %201, %199, %177 : vector<2x32xi1>, vector<2x32xf32>
    %203 = arith.select %201, %197, %178 : vector<2x32xi1>, vector<2x32xf32>
    %c8_i32 = arith.constant 8 : i32
    %c0_36 = arith.constant 0 : index
    %c0_37 = arith.constant 0 : index
    %204 = vector.load %arg3[%c0_36, %c0_37] : memref<2x32xf32, #tpu.memory_space<vmem>>, vector<2x32xf32>
    tpu.vector_store %arg3[%c0_36, %c0_37], %203 {strides = array<i32>} : memref<2x32xf32, #tpu.memory_space<vmem>>, vector<2x32xf32>,
    return
  }
}

</mosaic_0001>

<bundles_post_ra>
// kernel: text_encoder_forward.1
= control target key start
LH: loop header
LB: loop body
LE: loop exit
PB: predicated region body
PF: predicated region fallthrough
CT: control target
= control target key end

     0   :  { %v1181_v1 = vmov 0.0   ;;  %vm1182_vm0 = vmmov 0   ;;  %s1400_s0 = inlined_call_operand.vmem [shape: f32[8,2,128], index: 0, kind: input, shape index: {}]   ;;  %s1401_s1 = inlined_call_operand.vmem [shape: s32[2,32], index: 1, kind: input, shape index: {}]   ;;  %s1402_s2 = inlined_call_operand.vmem [shape: f32[32,128], index: 2, kind: input, shape index: {}]   ;;  %s1403_s3 = inlined_call_operand.hbm [shape: f32[2,32], index: 3, kind: output, shape index: {}]  }
   0x1   :  { %v1210_v0 = vld [vmem:[%s1402_s2 + $0x18] sm:$0xff]  ;;  %1003 = vmatprep.subr.mxu0 %v1181_v1  ;;  %v1216_v2 = vld [vmem:[%s1402_s2 + $0x10] sm:$0xff]  ;;  %1011 = vmatprep.mubr.msk.f32.mxu0 %vm1182_vm0, %v1181_v1 }
   0x2   :  { %8 = vsyncpa [#allocation3], 0  ;;  %1004 = vmatpush3.msra.mxu0 %v1210_v0  ;;  %1014 = vmatprep.subr.mxu1 %v1181_v1  ;;  %v1226_v3 = vld [vmem:[%s1402_s2 + $0x8] sm:$0xff]  ;;  %v1235_v4 = vld [vmem:[%s1402_s2] sm:$0xff]  ;;  %s1183_s21 = smov 32   ;;  %s1184_s22 = smov 96  }
   0x3   :  { %1005 = vmatprep.subr.mxu0 %v1181_v1  ;;  %1015 = vmatpush3.msra.mxu1 %v1210_v0  ;;  %v20_v5 = vld [vmem:[%s1400_s0] sm:$0x3]  ;;  %s1185_s25 = smov 64   ;;  %vm21_vm2 = vcmask 261120   ;;  %v942_v27 = vld [vmem:[%s1400_s0 + $0x2] sm:$0x3] }
   0x4   :  { %1006 = vmatpush3.msra.mxu0 %v1216_v2  ;;  %1016 = vmatprep.subr.mxu1 %v1181_v1  ;;  %v1270_v20 = vld [vmem:[%s1401_s1] sm:$0x3]  ;;  %v945_v49 = vld [vmem:[%s1400_s0 + $0x4] sm:$0x3]  ;;  %vm925_vm10 = vcmask 254976  }
   0x5   :  { %1007 = vmatprep.subr.mxu0 %v1181_v1  ;;  %1017 = vmatpush3.msra.mxu1 %v1216_v2  ;;  %vm120_vm1 = vcmp.gt.s32.totalorder %v1270_v20, 0  ;;  %vm235_vm3 = vcmp.gt.s32.totalorder %v1270_v20, 1  ;;  %vm350_vm4 = vcmp.gt.s32.totalorder %v1270_v20, 2  ;;  %vm465_vm5 = vcmp.gt.s32.totalorder %v1270_v20, 3 }
   0x6   :  { %1008 = vmatpush3.msra.mxu0 %v1226_v3  ;;  %1018 = vmatprep.subr.mxu1 %v1181_v1  ;;  %vm580_vm6 = vcmp.gt.s32.totalorder %v1270_v20, 4  ;;  %vm695_vm7 = vcmp.gt.s32.totalorder %v1270_v20, 5  ;;  %vm810_vm8 = vcmp.gt.s32.totalorder %v1270_v20, 6  ;;  %vm919_vm9 = vcmp.gt.s32.totalorder %v1270_v20, 7 }
   0x7   :  { %1009 = vmatprep.subr.mxu0 %v1181_v1  ;;  %1019 = vmatpush3.msra.mxu1 %v1226_v3 }
   0x8   :  { %1010 = vmatpush3.msra.mxu0 %v1235_v4  ;;  %1020 = vmatprep.subr.mxu1 %v1181_v1 }
   0x9   :  { %1012 = vmatmul.mubr.f32.vlgmr.msra.gmra.mxu0 %v1181_v1  ;;  %1021 = vmatpush3.msra.mxu1 %v1235_v4 }
   0xa   :  { %1022 = vmatprep.mubr.msk.f32.mxu1 %vm1182_vm0, %v1181_v1  ;;  %1025 = vmatprep.subr.mxu0 %v1181_v1 }
   0xb   :  { %1026 = vmatpush3.msra.mxu0 %v1210_v0  ;;  %1033 = vmatprep.mubr.msk.f32.mxu0 %vm1182_vm0, %v1181_v1 }
   0xc   :  { %1027 = vmatprep.subr.mxu0 %v1181_v1  ;;  %1036 = vmatprep.subr.mxu1 %v1181_v1 }
   0xd   :  { %1028 = vmatpush3.msra.mxu0 %v1216_v2 }
   0xe   :  { %1029 = vmatprep.subr.mxu0 %v1181_v1 }
   0xf   :  { %1030 = vmatpush3.msra.mxu0 %v1226_v3 }
  0x10   :  { %1031 = vmatprep.subr.mxu0 %v1181_v1 }
  0x11   :  { %1032 = vmatpush3.msra.mxu0 %v1235_v4 }
  0x12   :  { %1047 = vmatprep.subr.mxu0 %v1181_v1 }
  0xc9   :  { %v91_v6 = vpop.f32.mrf.mxu0 }
  0xca   :  { %v95_v7 = vadd.f32 %v91_v6, %v20_v5 }
  0xcb   :  { %v1013_v8 = vpop.f32.mrf.mxu0 }
  0xcc   :  { %1097 = vtanh.f32 %v95_v7  ;;  %v941_v10 = vmul.f32 -1.442695, %v95_v7 }
  0xce   :  { %1099 = vpow2.f32 %v941_v10 }
  0xd9   :  { %v1098_v9 = vpop.eup %1097 }
  0xda   :  { %105 = vrot.lane.b32.xlu0 %v1098_v9, %s1183_s21 }
  0xdb   :  { %v1100_v11 = vpop.eup %1099 }
  0xdc   :  { %v99_v12 = vadd.f32 1.0, %v1100_v11 }
  0xde   :  { %1101 = vrcp.f32 %v99_v12  ;;  %v948_v12 = vld [vmem:[%s1400_s0 + $0x6] sm:$0x3] }
  0xeb   :  { %v1102_v13 = vpop.eup %1101 }
  0xec   :  { %v103_v16 = vmul.f32 0.0, %v1102_v13 }
 0x14c   :  { %v106_v14 = vpop.permute.xlu0 %105 }
 0x14d   :  { %v108_v15 = vmul.f32 %v1102_v13, %v106_v14 }
 0x14f   :  { %110 = vrot.lane.b32.xlu0 %v108_v15, %s1183_s21 }
 0x1c1   :  { %v111_v17 = vpop.permute.xlu0 %110 }
 0x1c2   :  { %v113_v18 = vadd.f32 %v111_v17, %v103_v16 }
 0x1c4   :  { %1103 = vtanh.f32 %v113_v18  ;;  %127 = vrot.lane.b32.xlu0 %v113_v18, %s1184_s22 }
 0x1d1   :  { %v1104_v19 = vpop.eup %1103 }
 0x1d2   :  { %116 = vrot.lane.b32.xlu1 %v1104_v19, %s1183_s21 }
 0x236   :  { %v128_v21 = vpop.permute.xlu0 %127 }
 0x237   :  { %v130_v22 = vsel %vm120_vm1, %v128_v21, 0.0 }
 0x238   :  { %215 = vrot.lane.b32.xlu0 %v130_v22, %s1183_s21 }
 0x244   :  { %v117_v23 = vpop.permute.xlu1 %116 }
 0x245   :  { %v119_v24 = vmul.f32 %v1102_v13, %v117_v23 }
 0x247   :  { %122 = vrot.lane.b32.xlu1 %v119_v24, %s1185_s25 }
 0x2aa   :  { %v216_v38 = vpop.permute.xlu0 %215 }
 0x2b9   :  { %v123_v25 = vpop.permute.xlu1 %122 }
 0x2ba   :  { %v125_v26 = vsel %vm120_vm1, %v123_v25, 0.0 }
 0x2bb   :  { %1023 = vmatmul.mubr.msk.f32.vlgmr.msra.gmra.mxu1 %vm21_vm2, %v125_v26 }
 0x2bc   :  { %1037 = vmatpush3.msra.mxu1 %v1210_v0  ;;  %1044 = vmatprep.mubr.msk.f32.mxu1 %vm1182_vm0, %v1181_v1 }
 0x2bd   :  { %1038 = vmatprep.subr.mxu1 %v1181_v1 }
 0x2be   :  { %1039 = vmatpush3.msra.mxu1 %v1216_v2 }
 0x2bf   :  { %1040 = vmatprep.subr.mxu1 %v1181_v1 }
 0x2c0   :  { %1041 = vmatpush3.msra.mxu1 %v1226_v3 }
 0x2c1   :  { %1042 = vmatprep.subr.mxu1 %v1181_v1 }
 0x2c2   :  { %1043 = vmatpush3.msra.mxu1 %v1235_v4 }
 0x2c3   :  { %1058 = vmatprep.subr.mxu1 %v1181_v1 }
 0x37b   :  { %v202_v28 = vpop.f32.mrf.mxu1 }
 0x37c   :  { %v206_v29 = vadd.f32 %v942_v27, %v202_v28 }
 0x37d   :  { %v1024_v30 = vpop.f32.mrf.mxu1 }
 0x37e   :  { %1105 = vtanh.f32 %v206_v29  ;;  %v944_v32 = vmul.f32 -1.442695, %v206_v29 }
 0x380   :  { %1107 = vpow2.f32 %v944_v32 }
 0x38b   :  { %v1106_v31 = vpop.eup %1105 }
 0x38c   :  { %220 = vrot.lane.b32.xlu1 %v1106_v31, %s1183_s21 }
 0x38d   :  { %v1108_v33 = vpop.eup %1107 }
 0x38e   :  { %v210_v34 = vadd.f32 1.0, %v1108_v33 }
 0x390   :  { %1109 = vrcp.f32 %v210_v34 }
 0x39d   :  { %v1110_v35 = vpop.eup %1109 }
 0x39e   :  { %v218_v39 = vmul.f32 %v1110_v35, %v216_v38 }
 0x3fe   :  { %v221_v36 = vpop.permute.xlu1 %220 }
 0x3ff   :  { %v223_v37 = vmul.f32 %v1110_v35, %v221_v36 }
 0x401   :  { %225 = vrot.lane.b32.xlu1 %v223_v37, %s1183_s21 }
 0x473   :  { %v226_v40 = vpop.permute.xlu1 %225 }
 0x474   :  { %v228_v41 = vadd.f32 %v226_v40, %v218_v39 }
 0x476   :  { %1111 = vtanh.f32 %v228_v41 }
 0x483   :  { %v1112_v42 = vpop.eup %1111 }
 0x484   :  { %231 = vrot.lane.b32.xlu0 %v1112_v42, %s1183_s21 }
 0x488   :  { %242 = vrot.lane.b32.xlu0 %v228_v41, %s1184_s22 }
 0x4f6   :  { %v232_v43 = vpop.permute.xlu0 %231 }
 0x4f7   :  { %v234_v44 = vmul.f32 %v1110_v35, %v232_v43  ;;  %v951_v35 = vld [vmem:[%s1400_s0 + $0x8] sm:$0x3] }
 0x4f9   :  { %237 = vrot.lane.b32.xlu1 %v234_v44, %s1185_s25 }
 0x4fa   :  { %v243_v45 = vpop.permute.xlu0 %242 }
 0x4fb   :  { %v245_v46 = vsel %vm235_vm3, %v243_v45, %v130_v22 }
 0x4fc   :  { %330 = vrot.lane.b32.xlu0 %v245_v46, %s1183_s21 }
 0x56b   :  { %v238_v47 = vpop.permute.xlu1 %237 }
 0x56c   :  { %v240_v48 = vsel %vm235_vm3, %v238_v47, %v125_v26 }
 0x56d   :  { %1034 = vmatmul.mubr.msk.f32.vlgmr.msra.gmra.mxu0 %vm21_vm2, %v240_v48 }
 0x56e   :  { %1048 = vmatpush3.msra.mxu0 %v1210_v0  ;;  %1055 = vmatprep.mubr.msk.f32.mxu0 %vm1182_vm0, %v1181_v1  ;;  %v331_v60 = vpop.permute.xlu0 %330 }
 0x56f   :  { %1049 = vmatprep.subr.mxu0 %v1181_v1 }
 0x570   :  { %1050 = vmatpush3.msra.mxu0 %v1216_v2 }
 0x571   :  { %1051 = vmatprep.subr.mxu0 %v1181_v1 }
 0x572   :  { %1052 = vmatpush3.msra.mxu0 %v1226_v3 }
 0x573   :  { %1053 = vmatprep.subr.mxu0 %v1181_v1 }
 0x574   :  { %1054 = vmatpush3.msra.mxu0 %v1235_v4 }
 0x575   :  { %1069 = vmatprep.subr.mxu0 %v1181_v1 }
 0x62d   :  { %v317_v50 = vpop.f32.mrf.mxu0 }
 0x62e   :  { %v321_v51 = vadd.f32 %v945_v49, %v317_v50 }
 0x62f   :  { %v1035_v52 = vpop.f32.mrf.mxu0 }
 0x630   :  { %1113 = vtanh.f32 %v321_v51  ;;  %v947_v54 = vmul.f32 -1.442695, %v321_v51 }
 0x632   :  { %1115 = vpow2.f32 %v947_v54 }
 0x63d   :  { %v1114_v53 = vpop.eup %1113 }
 0x63e   :  { %335 = vrot.lane.b32.xlu1 %v1114_v53, %s1183_s21 }
 0x63f   :  { %v1116_v55 = vpop.eup %1115 }
 0x640   :  { %v325_v56 = vadd.f32 1.0, %v1116_v55 }
 0x642   :  { %1117 = vrcp.f32 %v325_v56 }
 0x64f   :  { %v1118_v57 = vpop.eup %1117 }
 0x650   :  { %v333_v61 = vmul.f32 %v1118_v57, %v331_v60 }
 0x6b0   :  { %v336_v58 = vpop.permute.xlu1 %335 }
 0x6b1   :  { %v338_v59 = vmul.f32 %v1118_v57, %v336_v58 }
 0x6b3   :  { %340 = vrot.lane.b32.xlu1 %v338_v59, %s1183_s21 }
 0x725   :  { %v341_v62 = vpop.permute.xlu1 %340 }
 0x726   :  { %v343_v63 = vadd.f32 %v341_v62, %v333_v61 }
 0x728   :  { %1119 = vtanh.f32 %v343_v63 }
 0x735   :  { %v1120_v5 = vpop.eup %1119 }
 0x736   :  { %346 = vrot.lane.b32.xlu0 %v1120_v5, %s1183_s21 }
 0x73a   :  { %357 = vrot.lane.b32.xlu0 %v343_v63, %s1184_s22 }
 0x7a8   :  { %v347_v6 = vpop.permute.xlu0 %346 }
 0x7a9   :  { %v349_v7 = vmul.f32 %v1118_v57, %v347_v6  ;;  %v954_v57 = vld [vmem:[%s1400_s0 + $0xa] sm:$0x3] }
 0x7ab   :  { %352 = vrot.lane.b32.xlu1 %v349_v7, %s1185_s25 }
 0x7ac   :  { %v358_v8 = vpop.permute.xlu0 %357 }
 0x7ad   :  { %v360_v9 = vsel %vm350_vm4, %v358_v8, %v245_v46 }
 0x7ae   :  { %445 = vrot.lane.b32.xlu0 %v360_v9, %s1183_s21 }
 0x81d   :  { %v353_v10 = vpop.permute.xlu1 %352 }
 0x81e   :  { %v355_v11 = vsel %vm350_vm4, %v353_v10, %v240_v48 }
 0x81f   :  { %1045 = vmatmul.mubr.msk.f32.vlgmr.msra.gmra.mxu1 %vm21_vm2, %v355_v11 }
 0x820   :  { %1059 = vmatpush3.msra.mxu1 %v1210_v0  ;;  %1066 = vmatprep.mubr.msk.f32.mxu1 %vm1182_vm0, %v1181_v1  ;;  %v446_v24 = vpop.permute.xlu0 %445 }
 0x821   :  { %1060 = vmatprep.subr.mxu1 %v1181_v1 }
 0x822   :  { %1061 = vmatpush3.msra.mxu1 %v1216_v2 }
 0x823   :  { %1062 = vmatprep.subr.mxu1 %v1181_v1 }
 0x824   :  { %1063 = vmatpush3.msra.mxu1 %v1226_v3 }
 0x825   :  { %1064 = vmatprep.subr.mxu1 %v1181_v1 }
 0x826   :  { %1065 = vmatpush3.msra.mxu1 %v1235_v4 }
 0x827   :  { %1080 = vmatprep.subr.mxu1 %v1181_v1 }
 0x8df   :  { %v432_v13 = vpop.f32.mrf.mxu1 }
 0x8e0   :  { %v436_v14 = vadd.f32 %v948_v12, %v432_v13 }
 0x8e1   :  { %v1046_v15 = vpop.f32.mrf.mxu1 }
 0x8e2   :  { %1121 = vtanh.f32 %v436_v14  ;;  %v950_v17 = vmul.f32 -1.442695, %v436_v14  ;;  %v957_v15 = vld [vmem:[%s1400_s0 + $0xc] sm:$0x3] }
 0x8e4   :  { %1123 = vpow2.f32 %v950_v17 }
 0x8ef   :  { %v1122_v16 = vpop.eup %1121 }
 0x8f0   :  { %450 = vrot.lane.b32.xlu1 %v1122_v16, %s1183_s21 }
 0x8f1   :  { %v1124_v18 = vpop.eup %1123 }
 0x8f2   :  { %v440_v19 = vadd.f32 1.0, %v1124_v18 }
 0x8f4   :  { %1125 = vrcp.f32 %v440_v19 }
 0x901   :  { %v1126_v21 = vpop.eup %1125 }
 0x902   :  { %v448_v25 = vmul.f32 %v1126_v21, %v446_v24 }
 0x962   :  { %v451_v22 = vpop.permute.xlu1 %450 }
 0x963   :  { %v453_v23 = vmul.f32 %v1126_v21, %v451_v22 }
 0x965   :  { %455 = vrot.lane.b32.xlu1 %v453_v23, %s1183_s21 }
 0x9d7   :  { %v456_v26 = vpop.permute.xlu1 %455 }
 0x9d8   :  { %v458_v27 = vadd.f32 %v456_v26, %v448_v25 }
 0x9da   :  { %1127 = vtanh.f32 %v458_v27 }
 0x9e7   :  { %v1128_v28 = vpop.eup %1127 }
 0x9e8   :  { %461 = vrot.lane.b32.xlu0 %v1128_v28, %s1183_s21 }
 0x9ec   :  { %472 = vrot.lane.b32.xlu0 %v458_v27, %s1184_s22 }
 0xa5a   :  { %v462_v29 = vpop.permute.xlu0 %461 }
 0xa5b   :  { %v464_v30 = vmul.f32 %v1126_v21, %v462_v29 }
 0xa5d   :  { %467 = vrot.lane.b32.xlu1 %v464_v30, %s1185_s25 }
 0xa5e   :  { %v473_v31 = vpop.permute.xlu0 %472 }
 0xa5f   :  { %v475_v32 = vsel %vm465_vm5, %v473_v31, %v360_v9 }
 0xa60   :  { %560 = vrot.lane.b32.xlu0 %v475_v32, %s1183_s21 }
 0xacf   :  { %v468_v33 = vpop.permute.xlu1 %467 }
 0xad0   :  { %v470_v34 = vsel %vm465_vm5, %v468_v33, %v355_v11 }
 0xad1   :  { %1056 = vmatmul.mubr.msk.f32.vlgmr.msra.gmra.mxu0 %vm21_vm2, %v470_v34 }
 0xad2   :  { %1070 = vmatpush3.msra.mxu0 %v1210_v0  ;;  %1077 = vmatprep.mubr.msk.f32.mxu0 %vm1182_vm0, %v1181_v1  ;;  %v561_v46 = vpop.permute.xlu0 %560 }
 0xad3   :  { %1071 = vmatprep.subr.mxu0 %v1181_v1 }
 0xad4   :  { %1072 = vmatpush3.msra.mxu0 %v1216_v2 }
 0xad5   :  { %1073 = vmatprep.subr.mxu0 %v1181_v1 }
 0xad6   :  { %1074 = vmatpush3.msra.mxu0 %v1226_v3 }
 0xad7   :  { %1075 = vmatprep.subr.mxu0 %v1181_v1 }
 0xad8   :  { %1076 = vmatpush3.msra.mxu0 %v1235_v4 }
 0xb91   :  { %v547_v36 = vpop.f32.mrf.mxu0 }
 0xb92   :  { %v551_v37 = vadd.f32 %v951_v35, %v547_v36 }
 0xb93   :  { %v1057_v38 = vpop.f32.mrf.mxu0 }
 0xb94   :  { %1129 = vtanh.f32 %v551_v37  ;;  %v953_v40 = vmul.f32 -1.442695, %v551_v37  ;;  %v960_v38 = vld [vmem:[%s1400_s0 + $0xe] sm:$0x3]  ;;  %s1186_s0 = smov [#allocation2]  }
 0xb95   :  { %s933_s12 = sshll.u32 %s1186_s0, 4  ;;  %s934_s12 = int_to_ptr.vmem [resolvable:$true] %s933_s12 }
 0xb96   :  { %1131 = vpow2.f32 %v953_v40  ;;  %s1159_s13 = scalar_lea.vmem %s934_s12, 32  ;;  %p1164_p1 = scmp.lt.s32.totalorder %s934_s12, %s934_s12 }
 0xb97   :  { %p1160_p0 = scmp.ne.s32.totalorder %s934_s12, %s1159_s13  ;;  %p1165_p2 = scmp.lt.s32.totalorder %s1159_s13, %s1159_s13 }
 0xb99   :  { %p1166_p3 = por %p1165_p2, %p1164_p1 }
 0xb9b   :  { %p1167_p4 = pnand %p1166_p3, %p1160_p0 }
 0xba1   :  { %v1130_v39 = vpop.eup %1129 }
 0xba2   :  { %565 = vrot.lane.b32.xlu1 %v1130_v39, %s1183_s21 }
 0xba3   :  { %v1132_v41 = vpop.eup %1131 }
 0xba4   :  { %v555_v42 = vadd.f32 1.0, %v1132_v41 }
 0xba6   :  { %1133 = vrcp.f32 %v555_v42 }
 0xbb3   :  { %v1134_v43 = vpop.eup %1133 }
 0xbb4   :  { %v563_v47 = vmul.f32 %v1134_v43, %v561_v46 }
 0xc14   :  { %v566_v44 = vpop.permute.xlu1 %565 }
 0xc15   :  { %v568_v45 = vmul.f32 %v1134_v43, %v566_v44 }
 0xc17   :  { %570 = vrot.lane.b32.xlu1 %v568_v45, %s1183_s21 }
 0xc89   :  { %v571_v48 = vpop.permute.xlu1 %570 }
 0xc8a   :  { %v573_v49 = vadd.f32 %v571_v48, %v563_v47 }
 0xc8c   :  { %1135 = vtanh.f32 %v573_v49 }
 0xc99   :  { %v1136_v50 = vpop.eup %1135 }
 0xc9a   :  { %576 = vrot.lane.b32.xlu0 %v1136_v50, %s1183_s21 }
 0xc9e   :  { %587 = vrot.lane.b32.xlu0 %v573_v49, %s1184_s22 }
 0xd0c   :  { %v577_v51 = vpop.permute.xlu0 %576 }
 0xd0d   :  { %v579_v52 = vmul.f32 %v1134_v43, %v577_v51 }
 0xd0f   :  { %582 = vrot.lane.b32.xlu1 %v579_v52, %s1185_s25 }
 0xd10   :  { %v588_v53 = vpop.permute.xlu0 %587 }
 0xd11   :  { %v590_v54 = vsel %vm580_vm6, %v588_v53, %v475_v32 }
 0xd12   :  { %675 = vrot.lane.b32.xlu0 %v590_v54, %s1183_s21 }
 0xd81   :  { %v583_v55 = vpop.permute.xlu1 %582 }
 0xd82   :  { %v585_v56 = vsel %vm580_vm6, %v583_v55, %v470_v34 }
 0xd83   :  { %1067 = vmatmul.mubr.msk.f32.vlgmr.msra.gmra.mxu1 %vm21_vm2, %v585_v56 }
 0xd84   :  { %1081 = vmatpush3.msra.mxu1 %v1210_v0  ;;  %1088 = vmatprep.mubr.msk.f32.mxu1 %vm1182_vm0, %v1181_v1 }
 0xd85   :  { %1082 = vmatprep.subr.mxu1 %v1181_v1 }
 0xd86   :  { %1083 = vmatpush3.msra.mxu1 %v1216_v2 }
 0xd87   :  { %1084 = vmatprep.subr.mxu1 %v1181_v1 }
 0xd88   :  { %1085 = vmatpush3.msra.mxu1 %v1226_v3 }
 0xd89   :  { %1086 = vmatprep.subr.mxu1 %v1181_v1 }
 0xd8a   :  { %1087 = vmatpush3.msra.mxu1 %v1235_v4  ;;  %v676_v4 = vpop.permute.xlu0 %675 }
 0xe43   :  { %v662_v0 = vpop.f32.mrf.mxu1 }
 0xe44   :  { %v666_v58 = vadd.f32 %v954_v57, %v662_v0 }
 0xe45   :  { %v1068_v59 = vpop.f32.mrf.mxu1 }
 0xe46   :  { %1137 = vtanh.f32 %v666_v58  ;;  %v956_v2 = vmul.f32 -1.442695, %v666_v58 }
 0xe48   :  { %1139 = vpow2.f32 %v956_v2 }
 0xe53   :  { %v1138_v60 = vpop.eup %1137 }
 0xe54   :  { %680 = vrot.lane.b32.xlu1 %v1138_v60, %s1183_s21 }
 0xe55   :  { %v1140_v61 = vpop.eup %1139 }
 0xe56   :  { %v670_v62 = vadd.f32 1.0, %v1140_v61 }
 0xe58   :  { %1141 = vrcp.f32 %v670_v62 }
 0xe65   :  { %v1142_v3 = vpop.eup %1141 }
 0xe66   :  { %v678_v5 = vmul.f32 %v1142_v3, %v676_v4 }
 0xec6   :  { %v681_v1 = vpop.permute.xlu1 %680 }
 0xec7   :  { %v683_v63 = vmul.f32 %v1142_v3, %v681_v1 }
 0xec9   :  { %685 = vrot.lane.b32.xlu1 %v683_v63, %s1183_s21 }
 0xf3b   :  { %v686_v6 = vpop.permute.xlu1 %685 }
 0xf3c   :  { %v688_v7 = vadd.f32 %v686_v6, %v678_v5 }
 0xf3e   :  { %1143 = vtanh.f32 %v688_v7 }
 0xf4b   :  { %v1144_v8 = vpop.eup %1143 }
 0xf4c   :  { %691 = vrot.lane.b32.xlu0 %v1144_v8, %s1183_s21 }
 0xf50   :  { %702 = vrot.lane.b32.xlu0 %v688_v7, %s1184_s22 }
 0xfbe   :  { %v692_v9 = vpop.permute.xlu0 %691 }
 0xfbf   :  { %v694_v10 = vmul.f32 %v1142_v3, %v692_v9 }
 0xfc1   :  { %697 = vrot.lane.b32.xlu1 %v694_v10, %s1185_s25 }
 0xfc2   :  { %v703_v11 = vpop.permute.xlu0 %702 }
 0xfc3   :  { %v705_v12 = vsel %vm695_vm7, %v703_v11, %v590_v54 }
 0xfc4   :  { %790 = vrot.lane.b32.xlu0 %v705_v12, %s1183_s21 }
0x1033   :  { %v698_v13 = vpop.permute.xlu1 %697 }
0x1034   :  { %v700_v14 = vsel %vm695_vm7, %v698_v13, %v585_v56 }
0x1035   :  { %1078 = vmatmul.mubr.msk.f32.vlgmr.msra.gmra.mxu0 %vm21_vm2, %v700_v14 }
0x1036   :  { %v791_v27 = vpop.permute.xlu0 %790 }
0x10f5   :  { %v777_v16 = vpop.f32.mrf.mxu0 }
0x10f6   :  { %v781_v17 = vadd.f32 %v957_v15, %v777_v16 }
0x10f7   :  { %v1079_v18 = vpop.f32.mrf.mxu0 }
0x10f8   :  { %1145 = vtanh.f32 %v781_v17  ;;  %v959_v21 = vmul.f32 -1.442695, %v781_v17 }
0x10fa   :  { %1147 = vpow2.f32 %v959_v21 }
0x1105   :  { %v1146_v19 = vpop.eup %1145 }
0x1106   :  { %795 = vrot.lane.b32.xlu1 %v1146_v19, %s1183_s21 }
0x1107   :  { %v1148_v22 = vpop.eup %1147 }
0x1108   :  { %v785_v23 = vadd.f32 1.0, %v1148_v22 }
0x110a   :  { %1149 = vrcp.f32 %v785_v23 }
0x1117   :  { %v1150_v24 = vpop.eup %1149 }
0x1118   :  { %v793_v28 = vmul.f32 %v1150_v24, %v791_v27 }
0x1178   :  { %v796_v25 = vpop.permute.xlu1 %795 }
0x1179   :  { %v798_v26 = vmul.f32 %v1150_v24, %v796_v25 }
0x117b   :  { %800 = vrot.lane.b32.xlu1 %v798_v26, %s1183_s21 }
0x11ed   :  { %v801_v29 = vpop.permute.xlu1 %800 }
0x11ee   :  { %v803_v30 = vadd.f32 %v801_v29, %v793_v28 }
0x11f0   :  { %1151 = vtanh.f32 %v803_v30 }
0x11fd   :  { %v1152_v31 = vpop.eup %1151 }
0x11fe   :  { %806 = vrot.lane.b32.xlu0 %v1152_v31, %s1183_s21 }
0x1202   :  { %817 = vrot.lane.b32.xlu0 %v803_v30, %s1184_s22 }
0x1270   :  { %v807_v32 = vpop.permute.xlu0 %806 }
0x1271   :  { %v809_v33 = vmul.f32 %v1150_v24, %v807_v32 }
0x1273   :  { %812 = vrot.lane.b32.xlu1 %v809_v33, %s1185_s25 }
0x1274   :  { %v818_v34 = vpop.permute.xlu0 %817 }
0x1275   :  { %v820_v35 = vsel %vm810_vm8, %v818_v34, %v705_v12 }
0x1276   :  { %905 = vrot.lane.b32.xlu0 %v820_v35, %s1183_s21 }
0x12e5   :  { %v813_v36 = vpop.permute.xlu1 %812 }
0x12e6   :  { %v815_v37 = vsel %vm810_vm8, %v813_v36, %v700_v14 }
0x12e7   :  { %1089 = vmatmul.mubr.msk.f32.vlgmr.msra.gmra.mxu1 %vm21_vm2, %v815_v37 }
0x12e8   :  { %v906_v49 = vpop.permute.xlu0 %905 }
0x13a7   :  { %v892_v39 = vpop.f32.mrf.mxu1 }
0x13a8   :  { %v896_v40 = vadd.f32 %v960_v38, %v892_v39 }
0x13a9   :  { %v1090_v41 = vpop.f32.mrf.mxu1 }
0x13aa   :  { %1153 = vtanh.f32 %v896_v40  ;;  %v962_v43 = vmul.f32 -1.442695, %v896_v40 }
0x13ac   :  { %1155 = vpow2.f32 %v962_v43 }
0x13b7   :  { %v1154_v42 = vpop.eup %1153 }
0x13b8   :  { %910 = vrot.lane.b32.xlu1 %v1154_v42, %s1183_s21 }
0x13b9   :  { %v1156_v44 = vpop.eup %1155 }
0x13ba   :  { %v900_v45 = vadd.f32 1.0, %v1156_v44 }
0x13bc   :  { %1157 = vrcp.f32 %v900_v45 }
0x13c9   :  { %v1158_v46 = vpop.eup %1157 }
0x13ca   :  { %v908_v50 = vmul.f32 %v1158_v46, %v906_v49 }
0x142a   :  { %v911_v47 = vpop.permute.xlu1 %910 }
0x142b   :  { %v913_v48 = vmul.f32 %v1158_v46, %v911_v47 }
0x142d   :  { %915 = vrot.lane.b32.xlu1 %v913_v48, %s1183_s21 }
0x149f   :  { %v916_v51 = vpop.permute.xlu1 %915 }
0x14a0   :  { %v918_v52 = vadd.f32 %v916_v51, %v908_v50 }
0x14a2   :  { %921 = vrot.lane.b32.xlu0 %v918_v52, %s1184_s22 }
0x1514   :  { %v922_v53 = vpop.permute.xlu0 %921 }
0x1515   :  { %v924_v54 = vsel %vm919_vm9, %v922_v53, %v820_v35 }
0x1516   :  { %926 = vst.msk [vmem:[#allocation2] sm:$0x3] %vm925_vm10, %v924_v54 }
0x1517   :  { %1170 = shalt.err (!%p1167_p4)
}
0x1518   :  { %936 = dma.vmem_to_hbm [thread:$0]  %s934_s12, 32, %s1403_s3, [#allocation3]  }
0x1519   :  { %1179 = dma.done.wait [#allocation3], 32  }
0x151a   :  { %1180 = vsyncadd [#allocation3], 4294967264 }
0x151b   :  { %940 = vsyncpa [#allocation3], 1 }

</bundles_post_ra>
